<compile_context>
chip_gen: v7x
topology: tpu7x:2x2x1
jax: 0.10.0
libtpu: 0.0.40
codegen_flags: <defaults>
</compile_context>

<pallas_src>
import jax
import jax.numpy as jnp
from jax.experimental import pallas as pl
from jax.experimental.pallas import tpu as pltpu


def autopad(k, p=None, d=1):
    if d > 1:
        k = d * (k - 1) + 1 if isinstance(k, int) else [d * (x - 1) + 1 for x in k]
    if p is None:
        p = k // 2 if isinstance(k, int) else [x // 2 for x in k]
    return p


def _conv_bn_silu_kernel(p_ref, w_ref, scale_ref, bias_ref, o_ref):
    # p_ref:     (1, K, TM)  im2col patches for one image / spatial tile
    # w_ref:     (C2, K)     conv weight, flattened (c1, ky, kx) -> K
    # scale_ref: (C2, 1)     folded BatchNorm scale = gamma / sqrt(var + eps)
    # bias_ref:  (C2, 1)     folded BatchNorm bias  = beta - mean * scale
    # o_ref:     (1, C2, TM) output tile: channels on sublanes, spatial on lanes
    acc = jnp.dot(w_ref[...], p_ref[0], preferred_element_type=jnp.float32)
    y = acc * scale_ref[...] + bias_ref[...]          # BatchNorm (eval, folded)
    y = y * jax.nn.sigmoid(y)                         # SiLU
    o_ref[0] = y.astype(o_ref.dtype)


def conv_bn_silu(x, weight, gamma, beta, running_mean, running_var, *,
                 stride=1, padding=None, dilation=1, groups=1,
                 eps=1e-5, tile_m=512):
    """act(bn(conv(x))) with act = SiLU, NCHW layout, eval-mode BatchNorm."""
    # TODO(synk): grouped convolution (g > 1), non-SiLU `act` modules, and
    # training-mode BatchNorm (batch statistics) are not implemented; the
    # YOLOv8 detect-path Conv blocks use g=1, SiLU, and inference-mode BN.
    assert groups == 1
    N, C1, H, W = x.shape
    C2, c1w, kh, kw = weight.shape
    assert c1w == C1
    s, d = int(stride), int(dilation)
    p = autopad(kh, padding, d)

    Ho = (H + 2 * p - d * (kh - 1) - 1) // s + 1
    Wo = (W + 2 * p - d * (kw - 1) - 1) // s + 1
    M = Ho * Wo
    K = C1 * kh * kw

    # --- im2col in the wrapper: layout plumbing only, all FLOPs stay in-kernel
    x_pad = jnp.pad(x, ((0, 0), (0, 0), (p, p), (p, p)))
    taps = []
    for ky in range(kh):
        for kx in range(kw):
            y0, x0 = ky * d, kx * d
            taps.append(x_pad[:, :,
                              y0:y0 + (Ho - 1) * s + 1:s,
                              x0:x0 + (Wo - 1) * s + 1:s])
    # (kh*kw, N, C1, Ho, Wo) -> (N, C1, kh*kw, Ho*Wo) -> (N, K, M)
    patches = jnp.stack(taps, axis=0).transpose(1, 2, 0, 3, 4).reshape(N, K, M)

    # --- fold BatchNorm (running stats) into a per-channel scale/bias epilogue
    scale = (gamma / jnp.sqrt(running_var + eps)).astype(jnp.float32)
    bias = (beta - running_mean * scale).astype(jnp.float32)
    w2d = weight.reshape(C2, K).astype(jnp.float32)
    scale2d = scale.reshape(C2, 1)
    bias2d = bias.reshape(C2, 1)

    # --- lane-dense spatial tile: multiple of 128, as big as VMEM allows
    itemsize = jnp.dtype(x.dtype).itemsize
    m128 = ((M + 127) // 128) * 128
    TM = min(int(tile_m), m128)
    vmem_budget = 8 * 1024 * 1024          # double-buffered in+out blocks
    while TM > 128 and 2 * (K + C2) * TM * itemsize > vmem_budget:
        TM //= 2
    TM = max(128, (TM // 128) * 128)
    Mp = ((M + TM - 1) // TM) * TM
    if Mp != M:
        patches = jnp.pad(patches, ((0, 0), (0, 0), (0, Mp - M)))

    grid = (N, Mp // TM)
    out = pl.pallas_call(
        _conv_bn_silu_kernel,
        out_shape=jax.ShapeDtypeStruct((N, C2, Mp), x.dtype),
        grid_spec=pl.GridSpec(
            grid=grid,
            in_specs=[
                pl.BlockSpec((1, K, TM), lambda n, m: (n, 0, m)),
                pl.BlockSpec((C2, K), lambda n, m: (0, 0)),
                pl.BlockSpec((C2, 1), lambda n, m: (0, 0)),
                pl.BlockSpec((C2, 1), lambda n, m: (0, 0)),
            ],
            out_specs=pl.BlockSpec((1, C2, TM), lambda n, m: (n, 0, m)),
        ),
        compiler_params=pltpu.CompilerParams(
            dimension_semantics=("parallel", "parallel"),
            vmem_limit_bytes=64 * 1024 * 1024,
        ),
    )(patches, w2d, scale2d, bias2d)

    return out[:, :, :M].reshape(N, C2, Ho, Wo)


if __name__ == "__main__":
    key = jax.random.PRNGKey(0)
    k_case1, k_case2 = jax.random.split(key, 2)

    N, C1, C2, H, W = 2, 4, 8, 16, 16
    eps = 1e-5

    def run_case(case_key, ksize, stride):
        kx, kw_, kg, kb, km, kv = jax.random.split(case_key, 6)
        x = jax.random.normal(kx, (N, C1, H, W), dtype=jnp.float32)
        w = 0.1 * jax.random.normal(kw_, (C2, C1, ksize, ksize),
                                    dtype=jnp.float32)
        gamma = 1.0 + 0.1 * jax.random.normal(kg, (C2,), dtype=jnp.float32)
        beta = 0.1 * jax.random.normal(kb, (C2,), dtype=jnp.float32)
        mean = 0.1 * jax.random.normal(km, (C2,), dtype=jnp.float32)
        var = jnp.abs(jax.random.normal(kv, (C2,), dtype=jnp.float32)) + 0.5

        out = conv_bn_silu(x, w, gamma, beta, mean, var, stride=stride)
        jax.block_until_ready(out)

        # Reference: XLA conv + identically folded eval-mode BN + SiLU.
        p = autopad(ksize, None, 1)
        dn = jax.lax.conv_dimension_numbers(x.shape, w.shape,
                                            ("NCHW", "OIHW", "NCHW"))
        ref = jax.lax.conv_general_dilated(
            x, w, window_strides=(stride, stride),
            padding=[(p, p), (p, p)], dimension_numbers=dn)
        scale = gamma / jnp.sqrt(var + eps)
        bias = beta - mean * scale
        ref = ref * scale.reshape(1, C2, 1, 1) + bias.reshape(1, C2, 1, 1)
        ref = ref * jax.nn.sigmoid(ref)

        assert out.shape == ref.shape, (out.shape, ref.shape)
        err = float(jnp.max(jnp.abs(out - ref)))
        assert jnp.allclose(out, ref, atol=1e-2, rtol=1e-2), err

    run_case(k_case1, ksize=3, stride=1)   # standard 3x3 Conv block
    run_case(k_case2, ksize=3, stride=2)   # 3x3 / s=2 downsampling Conv block

    print("KERNEL_OK")
</pallas_src>

<mosaic_0001>
module attributes {stable_mosaic.version = 11 : i64} {
  func.func @_conv_bn_silu_kernel(%arg0: i32, %arg1: i32, %arg2: memref<1x36x256xf32, #tpu.memory_space<vmem>>, %arg3: memref<8x36xf32, #tpu.memory_space<vmem>>, %arg4: memref<8x1xf32, #tpu.memory_space<vmem>>, %arg5: memref<8x1xf32, #tpu.memory_space<vmem>>, %arg6: memref<1x8x256xf32, #tpu.memory_space<vmem>>) attributes {dimension_semantics = [#tpu.dimension_semantics<parallel>, #tpu.dimension_semantics<parallel>], iteration_bounds = array<i64: 2, 1>, scalar_prefetch = 0 : i64, scratch_operands = 0 : i64, tpu.core_type = #tpu.core_type<tc>, window_params = [{transform_indices = @transform_0, window_bounds = array<i64: 1, 36, 256>}, {pipeline_mode = #tpu.pipeline_mode<synchronous>, transform_indices = @transform_1, window_bounds = array<i64: 8, 36>}, {pipeline_mode = #tpu.pipeline_mode<synchronous>, transform_indices = @transform_2, window_bounds = array<i64: 8, 1>}, {pipeline_mode = #tpu.pipeline_mode<synchronous>, transform_indices = @transform_3, window_bounds = array<i64: 8, 1>}, {transform_indices = @transform_4, window_bounds = array<i64: 1, 8, 256>}]} {
    %c0 = arith.constant 0 : index
    %c0_0 = arith.constant 0 : index
    %0 = vector.load %arg3[%c0, %c0_0] : memref<8x36xf32, #tpu.memory_space<vmem>>, vector<8x36xf32>
    %c0_1 = arith.constant 0 : index
    %c0_2 = arith.constant 0 : index
    %c0_3 = arith.constant 0 : index
    %1 = vector.load %arg2[%c0_1, %c0_2, %c0_3] : memref<1x36x256xf32, #tpu.memory_space<vmem>>, vector<1x36x256xf32>
    %2 = vector.shape_cast %1 : vector<1x36x256xf32> to vector<36x256xf32>
    %cst = arith.constant dense<0.000000e+00> : vector<8x256xf32>
    %3 = tpu.matmul %0, %2, %cst {dimension_numbers = #tpu.dot_dimension_numbers<[1], [0], [0], [1], [0, 0, 1, 1], [], []>} : vector<8x36xf32>, vector<36x256xf32>, vector<8x256xf32> -> vector<8x256xf32>
    %c0_4 = arith.constant 0 : index
    %c0_5 = arith.constant 0 : index
    %4 = vector.load %arg4[%c0_4, %c0_5] : memref<8x1xf32, #tpu.memory_space<vmem>>, vector<8x1xf32>
    %5 = vector.broadcast %4 : vector<8x1xf32> to vector<8x256xf32>
    %6 = arith.mulf %3, %5 : vector<8x256xf32>
    %c0_6 = arith.constant 0 : index
    %c0_7 = arith.constant 0 : index
    %7 = vector.load %arg5[%c0_6, %c0_7] : memref<8x1xf32, #tpu.memory_space<vmem>>, vector<8x1xf32>
    %8 = vector.broadcast %7 : vector<8x1xf32> to vector<8x256xf32>
    %9 = arith.addf %6, %8 : vector<8x256xf32>
    %10 = arith.negf %9 : vector<8x256xf32>
    %11 = math.exp %10 : vector<8x256xf32>
    %cst_8 = arith.constant 1.000000e+00 : f32
    %12 = vector.broadcast %cst_8 : f32 to vector<8x256xf32>
    %13 = arith.addf %12, %11 : vector<8x256xf32>
    %14 = arith.divf %12, %13 : vector<8x256xf32>
    %15 = arith.mulf %9, %14 : vector<8x256xf32>
    %c0_9 = arith.constant 0 : index
    %c0_10 = arith.constant 0 : index
    %c0_11 = arith.constant 0 : index
    %16 = vector.load %arg6[%c0_9, %c0_10, %c0_11] : memref<1x8x256xf32, #tpu.memory_space<vmem>>, vector<1x8x256xf32>
    %17 = vector.shape_cast %16 : vector<1x8x256xf32> to vector<8x256xf32>
    %18 = vector.shape_cast %15 : vector<8x256xf32> to vector<1x8x256xf32>
    tpu.vector_store %arg6[%c0_9, %c0_10, %c0_11], %18 {strides = array<i32>} : memref<1x8x256xf32, #tpu.memory_space<vmem>>, vector<1x8x256xf32>,
    return
  }
  func.func @transform_0(%arg0: i32, %arg1: i32) -> (i32, i32, i32) {
    %c0_i32 = arith.constant 0 : i32
    %c0_i32_0 = arith.constant 0 : i32
    return %arg0, %c0_i32, %arg1 : i32, i32, i32
  }
  func.func @transform_1(%arg0: i32, %arg1: i32) -> (i32, i32) {
    %c0_i32 = arith.constant 0 : i32
    %c0_i32_0 = arith.constant 0 : i32
    %c0_i32_1 = arith.constant 0 : i32
    return %c0_i32, %c0_i32_0 : i32, i32
  }
  func.func @transform_2(%arg0: i32, %arg1: i32) -> (i32, i32) {
    %c0_i32 = arith.constant 0 : i32
    %c0_i32_0 = arith.constant 0 : i32
    %c0_i32_1 = arith.constant 0 : i32
    return %c0_i32, %c0_i32_0 : i32, i32
  }
  func.func @transform_3(%arg0: i32, %arg1: i32) -> (i32, i32) {
    %c0_i32 = arith.constant 0 : i32
    %c0_i32_0 = arith.constant 0 : i32
    %c0_i32_1 = arith.constant 0 : i32
    return %c0_i32, %c0_i32_0 : i32, i32
  }
  func.func @transform_4(%arg0: i32, %arg1: i32) -> (i32, i32, i32) {
    %c0_i32 = arith.constant 0 : i32
    %c0_i32_0 = arith.constant 0 : i32
    return %arg0, %c0_i32, %arg1 : i32, i32, i32
  }
}

</mosaic_0001>

<bundles_post_ra>
// kernel: tpu_custom_call.1
= control target key start
LH: loop header
LB: loop body
LE: loop exit
PB: predicated region body
PF: predicated region fallthrough
CT: control target
= control target key end

     0   :  { %9 = vsyncpa [#allocation3], 0  ;;  %s1196_s0 = inlined_call_operand.hbm [shape: f32[2,36,256], index: 0, kind: input, shape index: {}]   ;;  %s1197_s1 = inlined_call_operand.hbm [shape: f32[8,36], index: 1, kind: input, shape index: {}]   ;;  %s1198_s2 = inlined_call_operand.hbm [shape: f32[8,1], index: 2, kind: input, shape index: {}]   ;;  %s1199_s3 = inlined_call_operand.hbm [shape: f32[8,1], index: 3, kind: input, shape index: {}]   ;;  %s1200_s4 = inlined_call_operand.hbm [shape: f32[2,8,256], index: 4, kind: output, shape index: {}]  }
   0x1   :  { %11 = vsyncpa [#allocation3 + $0x1], 0 }
   0x2   :  { %12 = vsyncpa [#allocation6], 0 }
   0x3   :  { %13 = vsyncpa [#allocation9], 0 }
   0x4   :  { %14 = vsyncpa [#allocation4], 0 }
   0x5   :  { %16 = vsyncpa [#allocation4 + $0x1], 0  ;;  %s910_s15 = smov 0   ;;  %s912_s16 = smov 0  }
   0x6   :  { %s914_s17 = smov 0   ;;  %s916_s18 = smov 0  }
   0x7   :  { %s918_s19 = smov 0   ;;  %s920_s20 = smov 0  }
   0x8 LB: > { %s529_s21 = sadd.s32 4294967295, %s874_s20   ;;  %s530_s22 = sadd.s32 4294967294, %s874_s20   ;;  %s874_s20 = sphi %s920_s20, %s22_s20   ;;  %s870_s19 = sphi %s918_s19, %s1224_s19   ;;  %s866_s18 = sphi %s916_s18, %s1223_s18   ;;  %s862_s17 = sphi %s914_s17, %s1222_s17   ;;  %s858_s16 = sphi %s912_s16, %s1221_s16   ;;  %s854_s15 = sphi %s910_s15, %s1220_s15  }
   0x9   : > { %p56_p0 = scmp.ne.s32.totalorder %s858_s16, %s854_s15  ;;  %p944_p1 = scmp.eq.s32.totalorder %s529_s21, 0 }
   0xa   : > { %p948_p2 = scmp.eq.s32.totalorder %s529_s21, 1  ;;  %p151_p3 = scmp.eq.s32.totalorder %s530_s22, 1 }
   0xb   : > { %s1205_s23 = scalar_select %p944_p1, 1, 0 }
   0xc   : > { %s1206_s24 = scalar_select %p948_p2, 1, 0 }
   0xd   : > { %p954_p4 = por %p944_p1, %p56_p0  ;;  %p531_p5 = scmp.ge.s32.totalorder %s874_s20, 1 }
   0xe   : > { %p959_p6 = por %p151_p3, %p56_p0  ;;  %p158_p7 = scmp.lt.s32.totalorder %s874_s20, 3 }
   0xf   : > { %s1207_s25 = scalar_select %p954_p4, 1, 0 }
  0x10   : > { %s1208_s26 = scalar_select %p959_p6, 1, 0 }
  0x11   : > { %p964_p8 = pnand %p531_p5, %p158_p7  ;;  %s876_s28 = smov [#allocation5]  }
  0x12   : > { %s171_s29 = sshll.u32 %s876_s28, 4  ;;  %s877_s30 = smov [#allocation7]   ;;  %s172_s29 = int_to_ptr.vmem [resolvable:$true] %s171_s29 }
  0x13   : > { %s1209_s27 = scalar_select %p964_p8, 1, 0 }
  0x14   : > { %p580_p10 = pneg %p964_p8  ;;  %s182_s5 = sshll.u32 %s877_s30, 4  ;;  %s977_s5 = int_to_ptr.vmem [resolvable:$true] %s182_s5 }
  0x15   : > { %s878_s7 = smov [#allocation8]   ;;  %s670_s11 = scalar_lea.hbm %s1197_s1, 128 }
  0x16   : > { %p973_p11 = pnand %p580_p10, %p944_p1  ;;  %s193_s8 = sshll.u32 %s878_s7, 4  ;;  %s979_s8 = int_to_ptr.vmem [resolvable:$true] %s193_s8 }
  0x17   : > { %p671_p12 = scmp.ne.s32.totalorder %s1197_s1, %s670_s11  ;;  %p677_p5 = scmp.lt.u32.totalorder %s670_s11, %s1197_s1 }
  0x18   : > { %p989_p13 = pneg %p973_p11 }
  0x1a   : > { %p673_p0 = pnand %p989_p13, %p671_p12 }
  0x1c   : > { %p674_p3 = pneg %p673_p0 }
  0x1e   : > { %p679_p7 = pnand %p677_p5, %p674_p3 }
  0x20   : > { %682 = shalt.err (!%p679_p7)
}
  0x21   : > { %s683_s28 = scalar_lea.vmem %s172_s29, 128  ;;  %p691_p1 = scmp.lt.s32.totalorder %s172_s29, %s172_s29 }
  0x22   : > { %p684_p10 = scmp.ne.s32.totalorder %s172_s29, %s683_s28  ;;  %p692_p4 = scmp.lt.s32.totalorder %s683_s28, %s683_s28 }
  0x24   : > { %p686_p9 = pnand %p684_p10, %p989_p13  ;;  %p693_p8 = por %p692_p4, %p691_p1 }
  0x26   : > { %p687_p6 = pneg %p686_p9 }
  0x28   : > { %p694_p2 = pnand %p693_p8, %p687_p6 }
  0x2a   : > { %697 = shalt.err (!%p694_p2)
}
  0x2b   : > { %583 = dma.hbm_to_vmem [thread:$0]  (!%p973_p11), %s1197_s1, 128, %s172_s29, [#allocation6]  }
  0x2c   : > { %s698_s11 = scalar_lea.hbm %s1198_s2, 128 }
  0x2d   : > { %p699_p9 = scmp.ne.s32.totalorder %s1198_s2, %s698_s11  ;;  %p705_p2 = scmp.lt.u32.totalorder %s698_s11, %s1198_s2 }
  0x2f   : > { %p701_p12 = pnand %p699_p9, %p989_p13 }
  0x31   : > { %p702_p1 = pneg %p701_p12 }
  0x33   : > { %p707_p4 = pnand %p705_p2, %p702_p1 }
  0x35   : > { %710 = shalt.err (!%p707_p4)
}
  0x36   : > { %s711_s29 = scalar_lea.vmem %s977_s5, 128  ;;  %p719_p3 = scmp.lt.s32.totalorder %s977_s5, %s977_s5 }
  0x37   : > { %p712_p6 = scmp.ne.s32.totalorder %s977_s5, %s711_s29  ;;  %p720_p5 = scmp.lt.s32.totalorder %s711_s29, %s711_s29 }
  0x39   : > { %p714_p8 = pnand %p712_p6, %p989_p13  ;;  %p721_p7 = por %p720_p5, %p719_p3 }
  0x3b   : > { %p715_p0 = pneg %p714_p8 }
  0x3d   : > { %p722_p10 = pnand %p721_p7, %p715_p0 }
  0x3f   : > { %725 = shalt.err (!%p722_p10)
}
  0x40   : > { %586 = dma.hbm_to_vmem [thread:$0]  (!%p973_p11), %s1198_s2, 128, %s977_s5, [#allocation6]  }
  0x41   : > { %s726_s10 = scalar_lea.hbm %s1199_s3, 128 }
  0x42   : > { %p727_p9 = scmp.ne.s32.totalorder %s1199_s3, %s726_s10  ;;  %p733_p2 = scmp.lt.u32.totalorder %s726_s10, %s1199_s3 }
  0x44   : > { %p729_p12 = pnand %p727_p9, %p989_p13 }
  0x46   : > { %p730_p1 = pneg %p729_p12 }
  0x48   : > { %p735_p4 = pnand %p733_p2, %p730_p1 }
  0x4a   : > { %738 = shalt.err (!%p735_p4)
}
  0x4b   : > { %s739_s5 = scalar_lea.vmem %s979_s8, 128  ;;  %p747_p3 = scmp.lt.s32.totalorder %s979_s8, %s979_s8 }
  0x4c   : > { %p740_p6 = scmp.ne.s32.totalorder %s979_s8, %s739_s5  ;;  %p748_p5 = scmp.lt.s32.totalorder %s739_s5, %s739_s5 }
  0x4e   : > { %p742_p8 = pnand %p740_p6, %p989_p13  ;;  %p749_p7 = por %p748_p5, %p747_p3 }
  0x50   : > { %p743_p0 = pneg %p742_p8 }
  0x52   : > { %p750_p10 = pnand %p749_p7, %p743_p0 }
  0x54   : > { %753 = shalt.err (!%p750_p10)
}
  0x55   : > { %589 = dma.hbm_to_vmem [thread:$0]  (!%p973_p11), %s1199_s3, 128, %s979_s8, [#allocation9]  }
  0x56   : > { %s43_s14 = sadd.s32 1, %s862_s17  ;;  %s34_s28 = sadd.s32 1, %s870_s19 }
  0x57   : > { %p50_p13 = scmp.ne.s32.totalorder %s862_s17, %s858_s16  ;;  %p36_p9 = scmp.ge.s32.totalorder %s34_s28, 2 }
  0x58   : > { %p51_p12 = scmp.eq.s32.totalorder %s874_s20, 0  ;;  %p1212_p1 = scmp.ne.s32.totalorder %s1206_s24, 0 }
  0x59   : > { %p601_p4 = scmp.lt.s32.totalorder %s874_s20, 2  ;;  %s1226_s28 = smov (%p36_p9, %s34_s28), 0 }
  0x5a   : > { %p1058_p2 = por %p1212_p1, %p50_p13  ;;  %p52_p6 = por %p51_p12, %p50_p13 }
  0x5b   : > { %s204_s30 = sand.u32 1, %s862_s17   ;;  %s38_s7 = ssub.s32 %s870_s19, %s1226_s28 }
  0x5c   : > { %p41_p8 = scmp.eq.s32.totalorder %s38_s7, 0  ;;  %s561_s8 = smul.u32 80, %s204_s30 }
  0x5d   : > { %s562_s9 = smul.u32 1280, %s870_s19  ;;  %p1069_p11 = pnand %p601_p4, %p52_p6 }
  0x5e   : > { %s1074_s24 = scalar_select %p41_p8, %s862_s17, %s43_s14  }
  0x5f   : > { %s1079_s13 = scalar_lea.hbm %s1196_s0, %s562_s9  ;;  %s208_s21 = scalar_lea.vmem [#allocation2], %s561_s8 }
  0x60   : > { %s217_s5 = sshll.u32 %s208_s21, 4  ;;  %s1083_s22 = scalar_lea.sflag [#allocation3], %s204_s30  ;;  %s1081_s5 = int_to_ptr.vmem [resolvable:$true] %s217_s5 }
  0x61   : > { %s754_s29 = scalar_lea.hbm %s1079_s13, 1280  ;;  %p756_p3 = pneg %p1069_p11 }
  0x62   : > { %p755_p0 = scmp.ne.s32.totalorder %s1079_s13, %s754_s29  ;;  %s759_s9 = scalar_lea.hbm %s1196_s0, 2560 }
  0x63   : > { %p760_p10 = scmp.lt.u32.totalorder %s1079_s13, %s1196_s0  ;;  %p761_p13 = scmp.lt.u32.totalorder %s759_s9, %s754_s29 }
  0x64   : > { %p757_p5 = pnand %p756_p3, %p755_p0  ;;  %p763_p12 = scmp.lt.u32.totalorder %s754_s29, %s1079_s13 }
  0x65   : > { %p762_p9 = por %p761_p13, %p760_p10 }
  0x66   : > { %p758_p7 = pneg %p757_p5 }
  0x67   : > { %p764_p1 = por %p763_p12, %p762_p9 }
  0x69   : > { %p765_p4 = pnand %p764_p1, %p758_p7 }
  0x6b   : > { %768 = shalt.err (!%p765_p4)
}
  0x6c   : > { %s769_s30 = scalar_lea.vmem %s1081_s5, 1280  ;;  %s879_s8 = smov [#allocation2]  }
  0x6d   : > { %p770_p6 = scmp.ne.s32.totalorder %s1081_s5, %s769_s30  ;;  %s774_s21 = sshll.u32 %s879_s8, 4  ;;  %s775_s21 = int_to_ptr.vmem [resolvable:$false] %s774_s21 }
  0x6e   : > { %s776_s14 = scalar_lea.vmem %s775_s21, 2560  ;;  %p777_p5 = scmp.lt.s32.totalorder %s1081_s5, %s775_s21 }
  0x6f   : > { %p772_p8 = pnand %p770_p6, %p756_p3  ;;  %p778_p10 = scmp.lt.s32.totalorder %s776_s14, %s769_s30 }
  0x71   : > { %p773_p0 = pneg %p772_p8  ;;  %p779_p13 = por %p778_p10, %p777_p5 }
  0x73   : > { %p780_p9 = pnand %p779_p13, %p773_p0 }
  0x75   : > { %783 = shalt.err (!%p780_p9)
}
  0x76   : > { %s880_s29 = smov 256   ;;  %s881_s7 = smov 16  }
  0x77   : > { %593 = dma.hbm_to_vmem [thread:$0]  (!%p1069_p11), %s1079_s13, 1280, %s1081_s5, %s1083_s22, %s880_s29, %s880_s29, %s881_s7  }
  0x78   : > { %p1215_p3 = scmp.ne.s32.totalorder %s1209_s27, 0 }
  0x79   : > { %s1114_s9 = sand.u32 (!%p1215_p3), 1, %s858_s16   ;;  %p1216_p7 = scmp.ne.s32.totalorder (!%p1215_p3), %s1207_s25, 0 }
  0x7a   : > { %229 = sbr.rel (%p1215_p3) target bundleno = 407 (0x197), region = 36  ;;  %s232_s12 = scalar_lea.sflag (!%p1215_p3), [#allocation3], %s1114_s9 }
  0x7b   : > { %s563_s11 = smul.u32 (!%p1215_p3), 80, %s1114_s9 }
  0x7d   : > { %s1118_s30 = scalar_lea.vmem (!%p1215_p3), [#allocation2], %s563_s11 }
  0x81   : > { %837 = dma.done.wait (%p1216_p7), %s232_s12, 1280  }
  0x82   : > { %839 = vsyncadd (%p1216_p7), %s232_s12, 4294966016  ;;  %p1217_p11 = scmp.ne.s32.totalorder %s1205_s23, 0 }
  0x84   : > { %841 = dma.done.wait (%p1217_p11), [#allocation6], 256  }
  0x85   : > { %843 = vsyncadd (%p1217_p11), [#allocation6], 4294967040 }
  0x86   : > { %845 = dma.done.wait (%p1217_p11), [#allocation9], 128  }
  0x87   : > { %847 = vsyncadd (%p1217_p11), [#allocation9], 4294967168  ;;  %v882_v0 = vmov 0.0   ;;  %v883_v1 = vmov 0   ;;  %v276_v2 = vld [vmem:[%s1118_s30 + $0x8] sm:$0xff]  ;;  %v278_v3 = vld [vmem:[%s1118_s30 + $0x18] sm:$0xff] }
  0x88   : > { %360 = vmatprep.mubr.f32.mxu0 %v882_v0  ;;  %661 = vset.pattern.permute.xlu0 %v883_v1  ;;  %v275_v4 = vld [vmem:[%s1118_s30] sm:$0xff]  ;;  %v553_v5 = vpack.c.bf16 %v278_v3, %v276_v2  ;;  %v277_v6 = vld [vmem:[%s1118_s30 + $0x10] sm:$0xff]  ;;  %v280_v7 = vld [vmem:[%s1118_s30 + $0x28] sm:$0xff]  ;;  %vm289_vm0 = vcmask 1043456   ;;  %vm285_vm1 = vcmask 293888   ;;  %s541_s23 = sshll.u32 %s1114_s9, 4 }
  0x89   : > { %v282_v8 = vld [vmem:[%s1118_s30 + $0x38] sm:$0xff]  ;;  %v555_v9 = vpack.c.bf16 %v277_v6, %v275_v4  ;;  %v279_v11 = vld [vmem:[%s1118_s30 + $0x20] sm:$0xff]  ;;  %v281_v12 = vld [vmem:[%s1118_s30 + $0x30] sm:$0xff]  ;;  %s552_s25 = sshll.u32 %s866_s18, 8  ;;  %s271_s27 = scalar_lea.vmem [#allocation10], %s541_s23 }
  0x8a   : > { %v557_v10 = vpack.c.bf16 %v282_v8, %v280_v7  ;;  %554 = vmatprep.subr.bf16.mxu0 %v553_v5  ;;  %v367_v13 = vld [vmem:[#allocation7] sm:$0xff]  ;;  %v559_v14 = vpack.c.bf16 %v281_v12, %v279_v11  ;;  %v375_v15 = vld [vmem:[#allocation8] sm:$0xff]  ;;  %v274_v18 = vld [vmem:[#allocation5] sm:$0xff]  ;;  %s416_s10 = sshll.u32 %s271_s27, 4  ;;  %s1147_s22 = scalar_lea.hbm %s1200_s4, %s552_s25  ;;  %s1149_s10 = int_to_ptr.vmem [resolvable:$true] %s416_s10 }
  0x8b   : > { %556 = vmatpush1.bf16.msra.mxu0 %v555_v9  ;;  %370 = vperm.xlu0 %661, %v367_v13   ;;  %v284_v16 = vld [vmem:[%s1118_s30 + $0x48] sm:$0xf]  ;;  %v283_v17 = vld [vmem:[%s1118_s30 + $0x40] sm:$0xf]  ;;  %s400_s8 = scalar_lea.sflag [#allocation4], %s1114_s9  ;;  %s784_s18 = scalar_lea.vmem %s1149_s10, 256 }
  0x8c   : > { %558 = vmatprep.subr.bf16.mxu0 %v557_v10  ;;  %p785_p12 = scmp.ne.s32.totalorder %s1149_s10, %s784_s18  ;;  %s884_s21 = smov [#allocation10]  }
  0x8d   : > { %s788_s14 = sshll.u32 %s884_s21, 4  ;;  %s789_s14 = int_to_ptr.vmem [resolvable:$false] %s788_s14 }
  0x8e   : > { %p786_p1 = pnand %p785_p12, %p1058_p2  ;;  %s790_s29 = scalar_lea.vmem %s789_s14, 512 }
  0x8f   : > { %560 = vmatpush1.bf16.msra.mxu0 %v559_v14  ;;  %378 = vperm.xlu0 %661, %v375_v15   ;;  %p791_p6 = scmp.lt.s32.totalorder %s1149_s10, %s789_s14  ;;  %p792_p8 = scmp.lt.s32.totalorder %s790_s29, %s784_s18 }
  0x90   : > { %542 = vmatprep.subr.msk.mxu0 %vm289_vm0, %v284_v16  ;;  %p787_p4 = pneg %p786_p1 }
  0x91   : > { %p793_p0 = por %p792_p8, %p791_p6 }
  0x93   : > { %543 = vmatpush1.msk.msra.mxu0 %vm289_vm0, %v283_v17  ;;  %p794_p5 = pnand %p793_p0, %p787_p4 }
  0x94   : > { %544 = vmatmul.mubr.msk.f32.vlgmr.msra.gmra.mrb[0].mxu0 %vm285_vm1, %v274_v18 }
 0x10a   : > { %v371_v19 = vpop.permute.xlu0 %370 }
 0x10e   : > { %v379_v23 = vpop.permute.xlu0 %378 }
 0x167   : > { %v362_v20 = vpop.f32.mrb[0].mxu0 }
 0x168   : > { %v373_v21 = vmul.f32 %v371_v19, %v362_v20  ;;  %v364_v22 = vpop.f32.mrb[1].mxu0 }
 0x169   : > { %v374_v24 = vmul.f32 %v371_v19, %v364_v22 }
 0x16a   : > { %v381_v25 = vadd.f32 %v379_v23, %v373_v21 }
 0x16b   : > { %v382_v26 = vadd.f32 %v379_v23, %v374_v24 }
 0x16c   : > { %v545_v27 = vmul.f32 -1.442695, %v381_v25 }
 0x16d   : > { %v546_v28 = vmul.f32 -1.442695, %v382_v26 }
 0x16e   : > { %662 = vpow2.f32 %v545_v27 }
 0x16f   : > { %664 = vpow2.f32 %v546_v28 }
 0x178   : > { %v663_v29 = vpop.eup %662 }
 0x179   : > { %v665_v30 = vpop.eup %664  ;;  %v389_v31 = vadd.f32 1.0, %v663_v29 }
 0x17a   : > { %v390_v32 = vadd.f32 1.0, %v665_v30 }
 0x17b   : > { %666 = vrcp.f32 %v389_v31 }
 0x17c   : > { %668 = vrcp.f32 %v390_v32 }
 0x185   : > { %v667_v33 = vpop.eup %666 }
 0x186   : > { %v669_v34 = vpop.eup %668  ;;  %v395_v35 = vmul.f32 %v667_v33, %v381_v25 }
 0x187   : > { %v396_v36 = vmul.f32 %v669_v34, %v382_v26 }
 0x188   : > { %397 = vst [vmem:[%s271_s27] sm:$0xff] %v395_v35 }
 0x189   : > { %398 = vst [vmem:[%s271_s27 + $0x8] sm:$0xff] %v396_v36 }
 0x18a   : > { %797 = shalt.err (!%p794_p5)
}
 0x18b   : > { %s798_s7 = scalar_lea.hbm %s1147_s22, 256  ;;  %s802_s12 = scalar_lea.hbm %s1200_s4, 512 }
 0x18c   : > { %p799_p10 = scmp.ne.s32.totalorder %s1147_s22, %s798_s7  ;;  %p803_p3 = scmp.lt.u32.totalorder %s1147_s22, %s1200_s4 }
 0x18d   : > { %p804_p7 = scmp.lt.u32.totalorder %s802_s12, %s798_s7  ;;  %p806_p12 = scmp.lt.u32.totalorder %s798_s7, %s1147_s22 }
 0x18e   : > { %p800_p13 = pnand %p799_p10, %p1058_p2 }
 0x18f   : > { %p805_p11 = por %p804_p7, %p803_p3 }
 0x190   : > { %p801_p9 = pneg %p800_p13 }
 0x191   : > { %p807_p1 = por %p806_p12, %p805_p11 }
 0x193   : > { %p808_p4 = pnand %p807_p1, %p801_p9 }
 0x195   : > { %811 = shalt.err (!%p808_p4)
}
 0x196   : > { %578 = dma.vmem_to_hbm [thread:$0]  (%p1058_p2), %s1149_s10, 256, %s1147_s22, %s400_s8  }
 0x197 PF: > { %s428_s25 = sand.u32 1, %s854_s15   ;;  %p1218_p6 = scmp.ne.s32.totalorder %s1208_s26, 0 }
 0x198   : > { %p1219_p8 = scmp.ge.s32.totalorder %s874_s20, 2  ;;  %s429_s27 = scalar_lea.sflag [#allocation4], %s428_s25 }
 0x19a   : > { %p595_p0 = pnand %p1219_p8, %p1218_p6 }
 0x19c   : > { %849 = dma.done.wait (!%p595_p0), %s429_s27, 256  }
 0x19d   : > { %851 = vsyncadd (!%p595_p0), %s429_s27, 4294967040  ;;  %s22_s20 = sadd.s32 1, %s874_s20   ;;  %s1220_s15 = smov %s858_s16 }
 0x19e   : > { %p19_p5 = scmp.ge.s32.totalorder %s22_s20, 4   ;;  %s1221_s16 = smov %s862_s17 }
 0x19f   : > { %s1222_s17 = smov %s1074_s24  ;;  %s1223_s18 = smov %s870_s19 }
 0x1a0   : > { %s1224_s19 = smov %s1226_s28  ;;  %21 = sbr.rel (!%p19_p5) target bundleno = 8 (0x8), region = 93 }
 0x1a7   :  { %434 = vsyncpa [#allocation3], 1 }
 0x1a8   :  { %436 = vsyncpa [#allocation3 + $0x1], 1 }
 0x1a9   :  { %437 = vsyncpa [#allocation6], 1 }
 0x1aa   :  { %438 = vsyncpa [#allocation9], 1 }
 0x1ab   :  { %439 = vsyncpa [#allocation4], 1 }
 0x1ac   :  { %441 = vsyncpa [#allocation4 + $0x1], 1 }

</bundles_post_ra>
